<compile_context>
chip_gen: v6e
topology: v6e:2x2x1
jax: 0.10.0
libtpu: 0.0.40
codegen_flags: <defaults>
</compile_context>

<pallas_src>
import functools
import math

import jax
import jax.numpy as jnp
from jax.experimental import pallas as pl
from jax.experimental.pallas import tpu as pltpu

LN_EPS = 1e-5
_INV_SQRT2 = 1.0 / math.sqrt(2.0)
_TANH_C = math.sqrt(2.0 / math.pi)


def _round_up(n, m):
    return ((n + m - 1) // m) * m


def cond_embedder_kernel(x_ref, w1_ref, w2_ref, p_ref, o_ref, *,
                         compute_dtype, approx_gelu):
    # In-kernel cast of x (free VPU work; avoids a separate host cast pass).
    x = x_ref[...].astype(compute_dtype)

    # Packed per-feature params: rows = [b1, b2, gamma, beta], all f32.
    params = p_ref[...]
    b1 = params[0:1, :]
    b2 = params[1:2, :]
    gamma = params[2:3, :]
    beta = params[3:4, :]

    # ----- Linear 1: h = x @ W1 + b1  (MXU, f32 accumulation) ----------------
    h = jnp.dot(x, w1_ref[...], preferred_element_type=jnp.float32) + b1

    # ----- GELU ---------------------------------------------------------------
    if approx_gelu:
        # tanh-approx GELU: transcendental goes to the EUP, few VALU ops.
        # Diverges from torch's exact-erf nn.GELU() by ~1e-3.
        inner = _TANH_C * (h + 0.044715 * (h * h * h))
        act = 0.5 * h * (1.0 + jnp.tanh(inner))
    else:
        # Exact erf form == torch nn.GELU() default (verification path).
        act = 0.5 * h * (1.0 + jax.lax.erf(h * _INV_SQRT2))

    # ----- Linear 2: y = act @ W2 + b2 ---------------------------------------
    y = jnp.dot(act.astype(compute_dtype), w2_ref[...],
                preferred_element_type=jnp.float32) + b2

    # ----- LayerNorm over last dim (biased variance, eps inside rsqrt), f32 --
    mean = jnp.mean(y, axis=-1, keepdims=True)
    cent = y - mean
    var = jnp.mean(cent * cent, axis=-1, keepdims=True)
    y_norm = cent * jax.lax.rsqrt(var + LN_EPS)

    o_ref[...] = (y_norm * gamma + beta).astype(o_ref.dtype)


def condition_embedder(x, w1, b1, w2, b2, gamma, beta, *,
                       tile_m=512, compute_dtype=jnp.bfloat16,
                       approx_gelu=None, out_dtype=None):
    """x: (..., context_dim) -> (..., hidden_size).

    w1: (context_dim, hidden), w2: (hidden, hidden)  (transposed vs PyTorch).
    compute_dtype: MXU operand dtype (bf16 fast path by default; f32 accumulate).
    approx_gelu:   None -> tanh GELU for bf16, exact erf for f32.
    out_dtype:     output dtype (default: x.dtype); bf16 halves write traffic.
    """
    orig_shape = x.shape
    context_dim = orig_shape[-1]
    hidden = w1.shape[1]
    if out_dtype is None:
        out_dtype = x.dtype
    if approx_gelu is None:
        approx_gelu = (compute_dtype == jnp.bfloat16)

    x2d = x.reshape(-1, context_dim)          # native dtype; cast happens in-kernel
    n_tok = x2d.shape[0]

    # --- token tile: multiple of 16, big for throughput ----------------------
    tm = max(16, min(_round_up(tile_m, 16), _round_up(n_tok, 16)))
    # v7x has 2 TensorCores: give mid/large single-tile batches >=2 grid steps
    # so the "parallel" grid axis can actually shard across cores.
    if n_tok >= 256 and pl.cdiv(n_tok, tm) < 2:
        tm = _round_up(pl.cdiv(n_tok, 2), 16)
    n_pad = _round_up(n_tok, tm)
    if n_pad != n_tok:
        # TODO(synk): for very large ragged batches a masked in-kernel tail
        # would avoid this host-side pad; here it only ever pads < tm rows.
        x2d = jnp.pad(x2d, ((0, n_pad - n_tok), (0, 0)))

    # --- parameter prep -------------------------------------------------------
    w1c = w1.astype(compute_dtype)
    w2c = w2.astype(compute_dtype)
    # Pack the four per-feature vectors into one grid-invariant (4, hidden) slab.
    params = jnp.stack([b1, b2, gamma, beta], axis=0).astype(jnp.float32)

    grid = (n_pad // tm,)
    kernel = functools.partial(cond_embedder_kernel,
                               compute_dtype=compute_dtype,
                               approx_gelu=approx_gelu)
    out = pl.pallas_call(
        kernel,
        out_shape=jax.ShapeDtypeStruct((n_pad, hidden), out_dtype),
        grid_spec=pltpu.PrefetchScalarGridSpec(
            num_scalar_prefetch=0,
            grid=grid,
            in_specs=[
                # x tile: last dim == full context_dim (no K padding needed).
                pl.BlockSpec((tm, context_dim), lambda i: (i, 0)),
                pl.BlockSpec((context_dim, hidden), lambda i: (0, 0)),  # W1
                pl.BlockSpec((hidden, hidden), lambda i: (0, 0)),       # W2
                pl.BlockSpec((4, hidden), lambda i: (0, 0)),            # b1,b2,gamma,beta
            ],
            out_specs=pl.BlockSpec((tm, hidden), lambda i: (i, 0)),
        ),
        compiler_params=pltpu.CompilerParams(
            dimension_semantics=("parallel",)),
    )(x2d, w1c, w2c, params)

    if n_pad != n_tok:
        out = out[:n_tok]
    return out.reshape(*orig_shape[:-1], hidden)


def _reference(x, w1, b1, w2, b2, gamma, beta, *, approx=False):
    h = x @ w1 + b1
    if approx:
        h = 0.5 * h * (1.0 + jnp.tanh(_TANH_C * (h + 0.044715 * h ** 3)))
    else:
        h = 0.5 * h * (1.0 + jax.lax.erf(h * _INV_SQRT2))
    y = h @ w2 + b2
    mean = jnp.mean(y, axis=-1, keepdims=True)
    var = jnp.mean((y - mean) ** 2, axis=-1, keepdims=True)
    return (y - mean) * jax.lax.rsqrt(var + LN_EPS) * gamma + beta


if __name__ == "__main__":
    # Small shapes consistent with the module:
    #   batch=2, seq=8 condition tokens, context_dim=64, hidden_size=128
    B, S, CTX, HID = 2, 8, 64, 128

    key = jax.random.PRNGKey(0)
    kx, k1, k2, k3, k4 = jax.random.split(key, 5)

    x = jax.random.normal(kx, (B, S, CTX), dtype=jnp.float32)

    # PyTorch layout would be (out, in); we store the transpose (in, out).
    w1 = jax.random.normal(k1, (CTX, HID), dtype=jnp.float32) * (1.0 / math.sqrt(CTX))
    b1 = jax.random.normal(k2, (HID,), dtype=jnp.float32) * 0.01
    w2 = jax.random.normal(k3, (HID, HID), dtype=jnp.float32) * (1.0 / math.sqrt(HID))
    b2 = jax.random.normal(k4, (HID,), dtype=jnp.float32) * 0.01
    gamma = jnp.ones((HID,), dtype=jnp.float32)   # nn.LayerNorm default affine init
    beta = jnp.zeros((HID,), dtype=jnp.float32)

    ref_erf = _reference(x, w1, b1, w2, b2, gamma, beta, approx=False)
    ref_tanh = _reference(x, w1, b1, w2, b2, gamma, beta, approx=True)

    # 1) f32 matmuls + exact erf GELU: tight check against the torch-exact ref.
    out_f32 = jax.block_until_ready(
        condition_embedder(x, w1, b1, w2, b2, gamma, beta,
                           compute_dtype=jnp.float32, approx_gelu=False))
    assert out_f32.shape == (B, S, HID)
    assert jnp.allclose(out_f32, ref_erf, atol=1e-4, rtol=1e-4), "f32/erf path mismatch"

    # 2) default fast path: bf16 matmuls + tanh GELU on the EUP.
    out_fast = jax.block_until_ready(
        condition_embedder(x, w1, b1, w2, b2, gamma, beta))
    assert out_fast.shape == (B, S, HID)
    assert jnp.allclose(out_fast, ref_tanh, atol=6e-2, rtol=6e-2), "bf16/tanh path mismatch"

    # 3) bf16 output option (halves write-side HBM traffic).
    out_bf16out = jax.block_until_ready(
        condition_embedder(x, w1, b1, w2, b2, gamma, beta, out_dtype=jnp.bfloat16))
    assert out_bf16out.dtype == jnp.bfloat16
    assert jnp.allclose(out_bf16out.astype(jnp.float32), ref_tanh,
                        atol=8e-2, rtol=8e-2), "bf16-output path mismatch"

    # 4) ragged token count exercises the tail padding / slicing path.
    x_r = x[:, :5, :]
    out_r = jax.block_until_ready(
        condition_embedder(x_r, w1, b1, w2, b2, gamma, beta,
                           compute_dtype=jnp.float32, approx_gelu=False))
    ref_r = _reference(x_r, w1, b1, w2, b2, gamma, beta, approx=False)
    assert out_r.shape == (B, 5, HID)
    assert jnp.allclose(out_r, ref_r, atol=1e-4, rtol=1e-4), "ragged path mismatch"

    print("KERNEL_OK")
</pallas_src>

<mosaic_0001>
module attributes {stable_mosaic.version = 11 : i64} {
  func.func @cond_embedder_kernel(%arg0: i32, %arg1: memref<16x64xf32, #tpu.memory_space<vmem>>, %arg2: memref<64x128xf32, #tpu.memory_space<vmem>>, %arg3: memref<128x128xf32, #tpu.memory_space<vmem>>, %arg4: memref<4x128xf32, #tpu.memory_space<vmem>>, %arg5: memref<16x128xf32, #tpu.memory_space<vmem>>) attributes {dimension_semantics = [#tpu.dimension_semantics<parallel>], iteration_bounds = array<i64: 1>, scalar_prefetch = 0 : i64, scratch_operands = 0 : i64, tpu.core_type = #tpu.core_type<tc>, window_params = [{transform_indices = @transform_0, window_bounds = array<i64: 16, 64>}, {pipeline_mode = #tpu.pipeline_mode<synchronous>, transform_indices = @transform_1, window_bounds = array<i64: 64, 128>}, {pipeline_mode = #tpu.pipeline_mode<synchronous>, transform_indices = @transform_2, window_bounds = array<i64: 128, 128>}, {pipeline_mode = #tpu.pipeline_mode<synchronous>, transform_indices = @transform_3, window_bounds = array<i64: 4, 128>}, {transform_indices = @transform_4, window_bounds = array<i64: 16, 128>}]} {
    %c0 = arith.constant 0 : index
    %c0_0 = arith.constant 0 : index
    %0 = vector.load %arg1[%c0, %c0_0] : memref<16x64xf32, #tpu.memory_space<vmem>>, vector<16x64xf32>
    %c0_1 = arith.constant 0 : index
    %c0_2 = arith.constant 0 : index
    %1 = vector.load %arg4[%c0_1, %c0_2] : memref<4x128xf32, #tpu.memory_space<vmem>>, vector<4x128xf32>
    %2 = vector.extract_strided_slice %1 {offsets = [0, 0], sizes = [1, 128], strides = [1, 1]} : vector<4x128xf32> to vector<1x128xf32>
    %3 = vector.extract_strided_slice %1 {offsets = [1, 0], sizes = [1, 128], strides = [1, 1]} : vector<4x128xf32> to vector<1x128xf32>
    %4 = vector.extract_strided_slice %1 {offsets = [2, 0], sizes = [1, 128], strides = [1, 1]} : vector<4x128xf32> to vector<1x128xf32>
    %5 = vector.extract_strided_slice %1 {offsets = [3, 0], sizes = [1, 128], strides = [1, 1]} : vector<4x128xf32> to vector<1x128xf32>
    %c0_3 = arith.constant 0 : index
    %c0_4 = arith.constant 0 : index
    %6 = vector.load %arg2[%c0_3, %c0_4] : memref<64x128xf32, #tpu.memory_space<vmem>>, vector<64x128xf32>
    %cst = arith.constant dense<0.000000e+00> : vector<16x128xf32>
    %7 = tpu.matmul %0, %6, %cst {dimension_numbers = #tpu.dot_dimension_numbers<[1], [0], [0], [1], [0, 0, 1, 1], [], []>} : vector<16x64xf32>, vector<64x128xf32>, vector<16x128xf32> -> vector<16x128xf32>
    %8 = vector.broadcast %2 : vector<1x128xf32> to vector<16x128xf32>
    %9 = arith.addf %7, %8 : vector<16x128xf32>
    %cst_5 = arith.constant 5.000000e-01 : f32
    %10 = vector.broadcast %cst_5 : f32 to vector<16x128xf32>
    %11 = arith.mulf %10, %9 : vector<16x128xf32>
    %cst_6 = arith.constant 0.707106769 : f32
    %12 = vector.broadcast %cst_6 : f32 to vector<16x128xf32>
    %13 = arith.mulf %9, %12 : vector<16x128xf32>
    %14 = math.erf %13 : vector<16x128xf32>
    %cst_7 = arith.constant 1.000000e+00 : f32
    %15 = vector.broadcast %cst_7 : f32 to vector<16x128xf32>
    %16 = arith.addf %15, %14 : vector<16x128xf32>
    %17 = arith.mulf %11, %16 : vector<16x128xf32>
    %c0_8 = arith.constant 0 : index
    %c0_9 = arith.constant 0 : index
    %18 = vector.load %arg3[%c0_8, %c0_9] : memref<128x128xf32, #tpu.memory_space<vmem>>, vector<128x128xf32>
    %cst_10 = arith.constant dense<0.000000e+00> : vector<16x128xf32>
    %19 = tpu.matmul %17, %18, %cst_10 {dimension_numbers = #tpu.dot_dimension_numbers<[1], [0], [0], [1], [0, 0, 1, 1], [], []>} : vector<16x128xf32>, vector<128x128xf32>, vector<16x128xf32> -> vector<16x128xf32>
    %20 = vector.broadcast %3 : vector<1x128xf32> to vector<16x128xf32>
    %21 = arith.addf %19, %20 : vector<16x128xf32>
    %cst_11 = arith.constant dense<0.000000e+00> : vector<16xf32>
    %22 = vector.multi_reduction <add>, %21, %cst_11 [1] : vector<16x128xf32> to vector<16xf32>
    %23 = vector.shape_cast %22 : vector<16xf32> to vector<16x1xf32>
    %cst_12 = arith.constant 1.280000e+02 : f32
    %24 = vector.broadcast %cst_12 : f32 to vector<16x1xf32>
    %25 = arith.divf %23, %24 : vector<16x1xf32>
    %26 = vector.broadcast %25 : vector<16x1xf32> to vector<16x128xf32>
    %27 = arith.subf %21, %26 : vector<16x128xf32>
    %28 = arith.mulf %27, %27 : vector<16x128xf32>
    %cst_13 = arith.constant dense<0.000000e+00> : vector<16xf32>
    %29 = vector.multi_reduction <add>, %28, %cst_13 [1] : vector<16x128xf32> to vector<16xf32>
    %30 = vector.shape_cast %29 : vector<16xf32> to vector<16x1xf32>
    %cst_14 = arith.constant 1.280000e+02 : f32
    %31 = vector.broadcast %cst_14 : f32 to vector<16x1xf32>
    %32 = arith.divf %30, %31 : vector<16x1xf32>
    %cst_15 = arith.constant 9.99999974E-6 : f32
    %33 = vector.broadcast %cst_15 : f32 to vector<16x1xf32>
    %34 = arith.addf %32, %33 : vector<16x1xf32>
    %35 = math.rsqrt %34 : vector<16x1xf32>
    %36 = vector.broadcast %35 : vector<16x1xf32> to vector<16x128xf32>
    %37 = arith.mulf %27, %36 : vector<16x128xf32>
    %38 = vector.broadcast %4 : vector<1x128xf32> to vector<16x128xf32>
    %39 = arith.mulf %37, %38 : vector<16x128xf32>
    %40 = vector.broadcast %5 : vector<1x128xf32> to vector<16x128xf32>
    %41 = arith.addf %39, %40 : vector<16x128xf32>
    %c0_16 = arith.constant 0 : index
    %c0_17 = arith.constant 0 : index
    %42 = vector.load %arg5[%c0_16, %c0_17] : memref<16x128xf32, #tpu.memory_space<vmem>>, vector<16x128xf32>
    tpu.vector_store %arg5[%c0_16, %c0_17], %41 {strides = array<i32>} : memref<16x128xf32, #tpu.memory_space<vmem>>, vector<16x128xf32>,
    return
  }
  func.func @transform_0(%arg0: i32) -> (i32, i32) {
    %c0_i32 = arith.constant 0 : i32
    %c0_i32_0 = arith.constant 0 : i32
    return %arg0, %c0_i32 : i32, i32
  }
  func.func @transform_1(%arg0: i32) -> (i32, i32) {
    %c0_i32 = arith.constant 0 : i32
    %c0_i32_0 = arith.constant 0 : i32
    %c0_i32_1 = arith.constant 0 : i32
    return %c0_i32, %c0_i32_0 : i32, i32
  }
  func.func @transform_2(%arg0: i32) -> (i32, i32) {
    %c0_i32 = arith.constant 0 : i32
    %c0_i32_0 = arith.constant 0 : i32
    %c0_i32_1 = arith.constant 0 : i32
    return %c0_i32, %c0_i32_0 : i32, i32
  }
  func.func @transform_3(%arg0: i32) -> (i32, i32) {
    %c0_i32 = arith.constant 0 : i32
    %c0_i32_0 = arith.constant 0 : i32
    %c0_i32_1 = arith.constant 0 : i32
    return %c0_i32, %c0_i32_0 : i32, i32
  }
  func.func @transform_4(%arg0: i32) -> (i32, i32) {
    %c0_i32 = arith.constant 0 : i32
    %c0_i32_0 = arith.constant 0 : i32
    return %arg0, %c0_i32 : i32, i32
  }
}

</mosaic_0001>

<bundles_post_ra>
// kernel: tpu_custom_call.1
= control target key start
LH: loop header
LB: loop body
LE: loop exit
PB: predicated region body
PF: predicated region fallthrough
CT: control target
= control target key end

     0   :  { %9 = vsyncpa [#allocation3], 0  ;;  %s560_s0 = inlined_call_operand.hbm [shape: f32[16,64], index: 0, kind: input, shape index: {}]   ;;  %s561_s1 = inlined_call_operand.hbm [shape: f32[64,128], index: 1, kind: input, shape index: {}]   ;;  %s562_s2 = inlined_call_operand.hbm [shape: f32[128,128], index: 2, kind: input, shape index: {}]   ;;  %s563_s3 = inlined_call_operand.vmem [shape: f32[4,128], index: 3, kind: input, shape index: {}]   ;;  %s564_s4 = inlined_call_operand.hbm [shape: f32[16,128], index: 4, kind: output, shape index: {}]  }
   0x1   :  { %10 = vsyncpa [#allocation6], 0 }
   0x2   :  { %11 = vsyncpa [#allocation4], 0  ;;  %s500_s15 = smov [#allocation5]   ;;  %s501_s17 = smov [#allocation2]  }
   0x3   :  { %s29_s16 = sshll.u32 %s500_s15, 4  ;;  %s17_s18 = sshll.u32 %s501_s17, 4  ;;  %s30_s16 = int_to_ptr.vmem [resolvable:$true] %s29_s16  ;;  %s18_s18 = int_to_ptr.vmem [resolvable:$true] %s17_s18 }
   0x4   :  { %s422_s19 = scalar_lea.vmem %s30_s16, 1024  ;;  %p427_p1 = scmp.lt.s32.totalorder %s30_s16, %s30_s16 }
   0x5   :  { %p423_p0 = scmp.ne.s32.totalorder %s30_s16, %s422_s19  ;;  %p428_p2 = scmp.lt.s32.totalorder %s422_s19, %s422_s19 }
   0x7   :  { %p429_p3 = por %p428_p2, %p427_p1 }
   0x9   :  { %p430_p4 = pnand %p429_p3, %p423_p0 }
   0xb   :  { %433 = shalt.err (!%p430_p4)
}
   0xc   :  { %s502_s20 = smov 128   ;;  %s503_s21 = smov 8  }
   0xd   :  { %35 = dma.hbm_to_vmem [thread:$0]  %s561_s1, 1024, %s30_s16, [#allocation6], %s502_s20, %s502_s20, %s503_s21  }
   0xe   :  { %s442_s24 = scalar_lea.vmem %s18_s18, 256  ;;  %p447_p6 = scmp.lt.s32.totalorder %s18_s18, %s18_s18 }
   0xf   :  { %p443_p5 = scmp.ne.s32.totalorder %s18_s18, %s442_s24  ;;  %p448_p7 = scmp.lt.s32.totalorder %s442_s24, %s442_s24 }
  0x11   :  { %p449_p8 = por %p448_p7, %p447_p6 }
  0x13   :  { %p450_p9 = pnand %p449_p8, %p443_p5 }
  0x15   :  { %453 = shalt.err (!%p450_p9)
}
  0x16   :  { %23 = dma.hbm_to_vmem [thread:$0]  %s560_s0, 256, %s18_s18, [#allocation3], %s502_s20, %s502_s20, %s503_s21  }
  0x17   :  { %s504_s27 = smov [#allocation7]  }
  0x18   :  { %s41_s28 = sshll.u32 %s504_s27, 4  ;;  %s42_s28 = int_to_ptr.vmem [resolvable:$true] %s41_s28 }
  0x19   :  { %s462_s29 = scalar_lea.vmem %s42_s28, 2048  ;;  %p467_p11 = scmp.lt.s32.totalorder %s42_s28, %s42_s28 }
  0x1a   :  { %p463_p10 = scmp.ne.s32.totalorder %s42_s28, %s462_s29  ;;  %p468_p12 = scmp.lt.s32.totalorder %s462_s29, %s462_s29 }
  0x1c   :  { %p469_p13 = por %p468_p12, %p467_p11 }
  0x1e   :  { %p470_p0 = pnand %p469_p13, %p463_p10 }
  0x20   :  { %473 = shalt.err (!%p470_p0)
}
  0x21   :  { %47 = dma.hbm_to_vmem [thread:$0]  %s562_s2, 2048, %s42_s28, [#allocation6], %s502_s20, %s502_s20, %s503_s21  }
  0x22   :  { %494 = dma.done.wait [#allocation3], 256  }
  0x23   :  { %495 = vsyncadd [#allocation3], 4294967040 }
  0x24   :  { %496 = dma.done.wait [#allocation6], 3072  }
  0x25   :  { %497 = vsyncadd [#allocation6], 4294964224  ;;  %v69_v0 = vld [vmem:[#allocation5 + $0x38] sm:$0xff]  ;;  %v68_v1 = vld [vmem:[#allocation5 + $0x30] sm:$0xff]  ;;  %vm74_vm0 = vcmask 523264   ;;  %v70_v26 = vlaneseq }
  0x26   :  { %346 = vmatprep.subr.mxu0 %v69_v0  ;;  %v67_v2 = vld [vmem:[#allocation5 + $0x28] sm:$0xff]  ;;  %v59_v3 = vld [vmem:[#allocation2] sm:$0xff]  ;;  %v181_v4 = vld [vmem:[#allocation7 + $0x78] sm:$0xff] }
  0x27   :  { %347 = vmatpush3.msra.mxu0 %v69_v0  ;;  %362 = vmatprep.mubr.msk.f32.mxu0 %vm74_vm0, %v59_v3  ;;  %v180_v5 = vld [vmem:[#allocation7 + $0x70] sm:$0xff]  ;;  %v66_v6 = vld [vmem:[#allocation5 + $0x20] sm:$0xff]  ;;  %v179_v7 = vld [vmem:[#allocation7 + $0x68] sm:$0xff]  ;;  %v71_v27 = vshrl.u32 %v70_v26, 7 }
  0x28   :  { %348 = vmatprep.subr.mxu0 %v68_v1  ;;  %365 = vmatprep.subr.mxu1 %v181_v4  ;;  %v65_v8 = vld [vmem:[#allocation5 + $0x18] sm:$0xff]  ;;  %v64_v9 = vld [vmem:[#allocation5 + $0x10] sm:$0xff]  ;;  %v63_v10 = vld [vmem:[#allocation5 + $0x8] sm:$0xff] }
  0x29   :  { %349 = vmatpush3.msra.mxu0 %v68_v1  ;;  %366 = vmatpush3.msra.mxu1 %v181_v4  ;;  %v62_v11 = vld [vmem:[#allocation5] sm:$0xff]  ;;  %v60_v12 = vld [vmem:[#allocation2 + $0x8] sm:$0xff]  ;;  %v176_v15 = vld [vmem:[#allocation7 + $0x50] sm:$0xff]  ;;  %v72_v28 = vsub.s32 0, %v71_v27  ;;  %v184_v45 = vsub.s32 1, %v71_v27  ;;  %v286_v1 = vsub.s32 2, %v71_v27 }
  0x2a   :  { %350 = vmatprep.subr.mxu0 %v67_v2  ;;  %367 = vmatprep.subr.mxu1 %v180_v5  ;;  %v178_v13 = vld [vmem:[#allocation7 + $0x60] sm:$0xff]  ;;  %v177_v14 = vld [vmem:[#allocation7 + $0x58] sm:$0xff]  ;;  %v175_v16 = vld [vmem:[#allocation7 + $0x48] sm:$0xff] }
  0x2b   :  { %351 = vmatpush3.msra.mxu0 %v67_v2  ;;  %368 = vmatpush3.msra.mxu1 %v180_v5  ;;  %v174_v17 = vld [vmem:[#allocation7 + $0x40] sm:$0xff]  ;;  %v173_v18 = vld [vmem:[#allocation7 + $0x38] sm:$0xff]  ;;  %v172_v19 = vld [vmem:[#allocation7 + $0x30] sm:$0xff]  ;;  %v292_v2 = vsub.s32 3, %v71_v27 }
  0x2c   :  { %352 = vmatprep.subr.mxu0 %v66_v6  ;;  %369 = vmatprep.subr.mxu1 %v179_v7  ;;  %v171_v20 = vld [vmem:[#allocation7 + $0x28] sm:$0xff]  ;;  %v170_v21 = vld [vmem:[#allocation7 + $0x20] sm:$0xff]  ;;  %v169_v22 = vld [vmem:[#allocation7 + $0x18] sm:$0xff] }
  0x2d   :  { %353 = vmatpush3.msra.mxu0 %v66_v6  ;;  %370 = vmatpush3.msra.mxu1 %v179_v7  ;;  %v168_v23 = vld [vmem:[#allocation7 + $0x10] sm:$0xff]  ;;  %v167_v24 = vld [vmem:[#allocation7 + $0x8] sm:$0xff]  ;;  %v166_v25 = vld [vmem:[#allocation7] sm:$0xff] }
  0x2e   :  { %354 = vmatprep.subr.mxu0 %v65_v8  ;;  %371 = vmatprep.subr.mxu1 %v178_v13  ;;  %v61_v29 = vld [vmem:[%s563_s3] sm:$0xf]  ;;  %s505_s3 = smov [#allocation8]  }
  0x2f   :  { %355 = vmatpush3.msra.mxu0 %v65_v8  ;;  %372 = vmatpush3.msra.mxu1 %v178_v13  ;;  %v73_v30 = vrot.slane %v61_v29, %v72_v28  ;;  %v185_v47 = vrot.slane %v61_v29, %v184_v45  ;;  %v287_v3 = vrot.slane %v61_v29, %v286_v1  ;;  %s303_s5 = sshll.u32 %s505_s3, 4  ;;  %s304_s5 = int_to_ptr.vmem [resolvable:$true] %s303_s5 }
  0x30   :  { %356 = vmatprep.subr.mxu0 %v64_v9  ;;  %373 = vmatprep.subr.mxu1 %v177_v14  ;;  %v293_v6 = vrot.slane %v61_v29, %v292_v2  ;;  %s474_s6 = scalar_lea.vmem %s304_s5, 256  ;;  %p479_p2 = scmp.lt.s32.totalorder %s304_s5, %s304_s5 }
  0x31   :  { %357 = vmatpush3.msra.mxu0 %v64_v9  ;;  %374 = vmatpush3.msra.mxu1 %v177_v14  ;;  %p475_p1 = scmp.ne.s32.totalorder %s304_s5, %s474_s6  ;;  %p480_p3 = scmp.lt.s32.totalorder %s474_s6, %s474_s6 }
  0x32   :  { %358 = vmatprep.subr.mxu0 %v63_v10  ;;  %375 = vmatprep.subr.mxu1 %v176_v15 }
  0x33   :  { %359 = vmatpush3.msra.mxu0 %v63_v10  ;;  %376 = vmatpush3.msra.mxu1 %v176_v15  ;;  %p481_p4 = por %p480_p3, %p479_p2 }
  0x34   :  { %360 = vmatprep.subr.mxu0 %v62_v11  ;;  %377 = vmatprep.subr.mxu1 %v175_v16 }
  0x35   :  { %361 = vmatpush3.msra.mxu0 %v62_v11  ;;  %378 = vmatpush3.msra.mxu1 %v175_v16  ;;  %p482_p5 = pnand %p481_p4, %p475_p1 }
  0x36   :  { %363 = vmatmul.mubr.msk.f32.vlgmr.msra.gmra.mxu0 %vm74_vm0, %v60_v12  ;;  %379 = vmatprep.subr.mxu1 %v174_v17 }
  0x37   :  { %380 = vmatpush3.msra.mxu1 %v174_v17 }
  0x38   :  { %381 = vmatprep.subr.mxu1 %v173_v18 }
  0x39   :  { %382 = vmatpush3.msra.mxu1 %v173_v18 }
  0x3a   :  { %383 = vmatprep.subr.mxu1 %v172_v19 }
  0x3b   :  { %384 = vmatpush3.msra.mxu1 %v172_v19 }
  0x3c   :  { %385 = vmatprep.subr.mxu1 %v171_v20 }
  0x3d   :  { %386 = vmatpush3.msra.mxu1 %v171_v20 }
  0x3e   :  { %387 = vmatprep.subr.mxu1 %v170_v21 }
  0x3f   :  { %388 = vmatpush3.msra.mxu1 %v170_v21 }
  0x40   :  { %389 = vmatprep.subr.mxu1 %v169_v22 }
  0x41   :  { %390 = vmatpush3.msra.mxu1 %v169_v22 }
  0x42   :  { %391 = vmatprep.subr.mxu1 %v168_v23 }
  0x43   :  { %392 = vmatpush3.msra.mxu1 %v168_v23 }
  0x44   :  { %393 = vmatprep.subr.mxu1 %v167_v24 }
  0x45   :  { %394 = vmatpush3.msra.mxu1 %v167_v24 }
  0x46   :  { %395 = vmatprep.subr.mxu1 %v166_v25 }
  0x47   :  { %396 = vmatpush3.msra.mxu1 %v166_v25 }
  0xf6   :  { %v364_v31 = vpop.f32.mrf.mxu0 }
  0xf7   :  { %v153_v32 = vadd.f32 %v364_v31, %v73_v30 }
  0xf8   :  { %v147_v33 = vpop.f32.mrf.mxu0 }
  0xf9   :  { %v159_v34 = vmul.f32 0.70710677, %v153_v32  ;;  %v148_v35 = vadd.f32 %v147_v33, %v73_v30  ;;  %v157_v42 = vmul.f32 0.5, %v153_v32 }
  0xfb   :  { %406 = verf.f32 %v159_v34  ;;  %v158_v36 = vmul.f32 0.70710677, %v148_v35  ;;  %v156_v40 = vmul.f32 0.5, %v148_v35 }
  0xfd   :  { %408 = verf.f32 %v158_v36 }
 0x108   :  { %v407_v37 = vpop.eup %406 }
 0x109   :  { %v163_v39 = vadd.f32 1.0, %v407_v37 }
 0x10a   :  { %v409_v38 = vpop.eup %408 }
 0x10b   :  { %v162_v41 = vadd.f32 1.0, %v409_v38  ;;  %v165_v44 = vmul.f32 %v163_v39, %v157_v42 }
 0x10d   :  { %v164_v43 = vmul.f32 %v162_v41, %v156_v40 }
 0x10f   :  { %397 = vmatprep.mubr.f32.mxu1 %v164_v43 }
 0x110   :  { %398 = vmatmul.mubr.f32.vlgmr.msra.gmra.mxu1 %v165_v44 }
 0x1d0   :  { %v399_v46 = vpop.f32.mrf.mxu1 }
 0x1d1   :  { %v258_v50 = vadd.f32 %v399_v46, %v185_v47 }
 0x1d2   :  { %v252_v48 = vpop.f32.mrf.mxu1 }
 0x1d3   :  { %v253_v49 = vadd.f32 %v252_v48, %v185_v47 }
 0x1d5   :  { %261 = vadd.xlane.f32.xlu0 %v253_v49 }
 0x1d9   :  { %263 = vadd.xlane.f32.xlu0 %v258_v50 }
 0x25e   :  { %v262_v51 = vpop.xlane.xlu0 %261 }
 0x25f   :  { %v266_v52 = vmul.f32 0.0078125, %v262_v51 }
 0x261   :  { %v268_v53 = vsub.f32 %v253_v49, %v266_v52 }
 0x262   :  { %v264_v54 = vpop.xlane.xlu0 %263 }
 0x263   :  { %v267_v55 = vmul.f32 0.0078125, %v264_v54  ;;  %v270_v56 = vmul.f32 %v268_v53, %v268_v53 }
 0x265   :  { %v269_v57 = vsub.f32 %v258_v50, %v267_v55  ;;  %272 = vadd.xlane.f32.xlu1 %v270_v56 }
 0x267   :  { %v271_v58 = vmul.f32 %v269_v57, %v269_v57 }
 0x269   :  { %274 = vadd.xlane.f32.xlu1 %v271_v58 }
 0x2ee   :  { %v273_v59 = vpop.xlane.xlu1 %272 }
 0x2ef   :  { %v276_v60 = vmul.f32 0.0078125, %v273_v59 }
 0x2f1   :  { %v278_v61 = vadd.f32 1e-05, %v276_v60 }
 0x2f2   :  { %v275_v62 = vpop.xlane.xlu1 %274 }
 0x2f3   :  { %410 = vrsqrt.f32 %v278_v61  ;;  %v277_v63 = vmul.f32 0.0078125, %v275_v62 }
 0x2f5   :  { %v279_v0 = vadd.f32 1e-05, %v277_v63 }
 0x2f7   :  { %412 = vrsqrt.f32 %v279_v0 }
 0x300   :  { %v411_v4 = vpop.eup %410 }
 0x301   :  { %v282_v5 = vmul.f32 %v411_v4, %v268_v53 }
 0x303   :  { %v288_v7 = vmul.f32 %v287_v3, %v282_v5 }
 0x304   :  { %v413_v8 = vpop.eup %412 }
 0x305   :  { %v283_v9 = vmul.f32 %v413_v8, %v269_v57  ;;  %v294_v10 = vadd.f32 %v293_v6, %v288_v7 }
 0x307   :  { %v289_v11 = vmul.f32 %v287_v3, %v283_v9  ;;  %296 = vst [vmem:[#allocation8] sm:$0xff] %v294_v10 }
 0x309   :  { %v295_v12 = vadd.f32 %v293_v6, %v289_v11 }
 0x30b   :  { %297 = vst [vmem:[#allocation8 + $0x8] sm:$0xff] %v295_v12 }
 0x30c   :  { %485 = shalt.err (!%p482_p5)
}
 0x30d   :  { %309 = dma.vmem_to_hbm [thread:$0]  %s304_s5, 256, %s564_s4, [#allocation4], %s502_s20, %s502_s20, %s503_s21  }
 0x30e   :  { %498 = dma.done.wait [#allocation4], 256  }
 0x30f   :  { %499 = vsyncadd [#allocation4], 4294967040 }
 0x310   :  { %313 = vsyncpa [#allocation3], 1 }
 0x311   :  { %314 = vsyncpa [#allocation6], 1 }
 0x312   :  { %315 = vsyncpa [#allocation4], 1 }

</bundles_post_ra>
